<compile_context>
chip_gen: v6e
topology: v6e:2x2x1
jax: 0.10.0
libtpu: 0.0.40
codegen_flags: <defaults>
</compile_context>

<pallas_src>
import math
from functools import partial

import numpy as np
import jax
import jax.numpy as jnp
from jax.experimental import pallas as pl
from jax.experimental.pallas import tpu as pltpu


def upsample_conv_kernel(x_ref, w_ref, o_ref, patch_ref, *,
                         cin_blk, n_shift, tpix, rel_offs, ones_rows):
    """One (batch, row-tile) grid step.

    x_ref:     (cin_blk, tile_len)  zero-padded, haloed, flattened x tile
                                    (channels padded to the sublane tile)
    w_ref:     (4*Cout, contr)      fused sub-pixel conv weight (+ bias column)
    o_ref:     (4*Cout, tpix)       lane-dense output tile
    patch_ref: (contr, tpix)        VMEM scratch; every row block is fully
                                    overwritten each step -> never zeroed
    """
    # Patch build: sublane-aligned block copies straight from the x Ref in the
    # compute dtype -- no masks, no upcast, no VPU arithmetic.
    for s, rel in enumerate(rel_offs):
        patch_ref[s * cin_blk:(s + 1) * cin_blk, :] = x_ref[:, rel:rel + tpix]

    # Constant ones block that carries the bias through the matmul.  Written
    # every step (it is tiny): scratch is per-core, so a "first grid step"
    # guard would be wrong when the parallel grid is split across TensorCores.
    patch_ref[n_shift * cin_blk:, :] = jnp.ones((ones_rows, tpix),
                                                patch_ref.dtype)

    # Single fused MXU matmul over the whole contraction (shifts x channels
    # + bias rows), f32 accumulation.
    acc = jnp.dot(w_ref[...], patch_ref[...],
                  preferred_element_type=jnp.float32)      # (4*Cout, tpix)
    o_ref[...] = acc.astype(o_ref.dtype)


def upsample_conv(x_nchw, w_oihw, bias, *, compute_dtype=jnp.float32,
                  out_dtype=jnp.float32, row_tile=None):
    """x_nchw: (N, Cin, H, W); w_oihw: (Cout, Cin, K, K) (PyTorch layout);
    bias: (Cout,).  Returns (N, Cout, 2H, 2W) in out_dtype."""
    N, Cin, H, W = x_nchw.shape
    Cout, Cin2, K, K2 = w_oihw.shape
    assert Cin2 == Cin and K2 == K and K % 2 == 1
    p = K // 2
    Wp = W + 2 * p                                  # padded low-res row width

    # ---- static sub-pixel bookkeeping --------------------------------------
    # Output pixel (2h+i, 2w+j), tap (kh, kw) reads low-res row h+(i+kh-p)//2
    # at sub-row (i+kh-p)%2 (same for columns).
    row_shifts = sorted({(i + kh - p) // 2 for i in range(2) for kh in range(K)})
    col_shifts = sorted({(j + kw - p) // 2 for j in range(2) for kw in range(K)})
    nsh, nsw = len(row_shifts), len(col_shifts)
    n_shift = nsh * nsw

    # Sublane-aligned per-shift channel block: 8 rows (f32) / 16 rows (bf16).
    cbytes = jnp.dtype(compute_dtype).itemsize
    sub = 8 * (4 // cbytes)
    cin_blk = -(-Cin // sub) * sub
    ones_rows = sub                                 # constant block -> bias
    contr = n_shift * cin_blk + ones_rows           # fused contraction length

    # ---- row tiling ---------------------------------------------------------
    if row_tile is None:
        # Long lane streams amortize MXU fill/drain + vst overhead; prefer a
        # divisor of H near the target so no rows are wasted.
        t = max(1, min(H, 2048 // Wp))
        cand = [c for c in range(t, max(1, t // 2) - 1, -1) if H % c == 0]
        row_tile = cand[0] if cand else t
    T = max(1, int(row_tile))
    H_pad = -(-H // T) * T                          # pad bottom rows if needed
    nT = H_pad // T
    tpix = T * Wp                                   # lane width of one tile

    # ---- per-shift lane offsets inside one haloed x tile --------------------
    offs = [dh * Wp + dw for dh in row_shifts for dw in col_shifts]
    off_min, off_max = min(offs), max(offs)
    rel_offs = tuple(o - off_min for o in offs)
    tile_len = (off_max - off_min) + tpix           # haloed x-tile length

    # ---- fused effective weight (4*Cout, contr) ------------------------------
    # cat([x]*4) + PixelShuffle(2): u channel cu at sub-position (i2, j2) is
    # x channel (4*cu + 2*i2 + j2) % Cin.  Fold that permutation plus the
    # KxK -> sub-pixel re-indexing into the weight once, statically.  Columns
    # are laid out at stride cin_blk per shift (pad channels -> zero columns).
    S = np.zeros((2, 2, K, K, Cin, n_shift * cin_blk), np.float32)
    for i in range(2):
        for j in range(2):
            for kh in range(K):
                dh, i2 = (i + kh - p) // 2, (i + kh - p) % 2
                a = row_shifts.index(dh)
                for kw in range(K):
                    dw, j2 = (j + kw - p) // 2, (j + kw - p) % 2
                    b = col_shifts.index(dw)
                    for cu in range(Cin):
                        cx = (4 * cu + 2 * i2 + j2) % Cin
                        S[i, j, kh, kw, cu, (a * nsw + b) * cin_blk + cx] += 1.0
    w_shift = jnp.einsum("ocuv,ijuvcq->ijoq",
                         w_oihw.astype(jnp.float32), jnp.asarray(S))
    w_shift = w_shift.reshape(4 * Cout, n_shift * cin_blk)
    b_col = jnp.tile(bias.astype(jnp.float32), 4).reshape(4 * Cout, 1)
    wbig = jnp.concatenate(
        [w_shift, b_col, jnp.zeros((4 * Cout, ones_rows - 1), jnp.float32)],
        axis=1).astype(compute_dtype)               # (4*Cout, contr)

    # ---- kernel input: zero-padded, flattened, per-tile haloed x slabs -------
    # Zero padding by p rows/cols reproduces the conv's zero padding exactly
    # (high-res OOB <=> low-res OOB), so no per-shift masks are needed.
    xp = jnp.pad(x_nchw.astype(compute_dtype),
                 ((0, 0), (0, cin_blk - Cin), (p, p + H_pad - H), (p, p)))
    x_flat = xp.reshape(N, cin_blk, (H_pad + 2 * p) * Wp)
    g_l = max(0, -((p + row_shifts[0]) * Wp + col_shifts[0]))
    g_r = max(0, (row_shifts[-1] - p) * Wp + col_shifts[-1])
    x_flat = jnp.pad(x_flat, ((0, 0), (0, 0), (g_l, g_r)))
    starts = [g_l + (t * T + p) * Wp + off_min for t in range(nT)]
    x_tiles = jnp.stack([x_flat[:, :, s:s + tile_len] for s in starts], axis=1)
    # (N, nT, cin_blk, tile_len); ~(T+2p)/T larger than x in HBM (see TODO).

    # ---- explicit VMEM budget (cap below v7x's 64 MiB physical per-TC) ------
    def _tile_bytes(rows, cols, itemsize):
        srow = 8 * (4 // itemsize)
        return (-(-rows // srow) * srow) * (-(-cols // 128) * 128) * itemsize

    obytes = jnp.dtype(out_dtype).itemsize
    vmem_est = (2 * _tile_bytes(cin_blk, tile_len, cbytes)     # x tile (dbl-buf)
                + 2 * _tile_bytes(4 * Cout, contr, cbytes)     # weight
                + 2 * _tile_bytes(4 * Cout, tpix, obytes)      # out tile (dbl-buf)
                + _tile_bytes(contr, tpix, cbytes)             # patch scratch
                + _tile_bytes(4 * Cout, tpix, 4))              # f32 acc temp
    vmem_limit = int(min(48 << 20, max(16 << 20, vmem_est + (8 << 20))))

    kernel = partial(upsample_conv_kernel, cin_blk=cin_blk, n_shift=n_shift,
                     tpix=tpix, rel_offs=rel_offs, ones_rows=ones_rows)

    out_raw = pl.pallas_call(
        kernel,
        out_shape=jax.ShapeDtypeStruct((N, nT, 4 * Cout, tpix), out_dtype),
        grid_spec=pltpu.PrefetchScalarGridSpec(
            num_scalar_prefetch=0,
            grid=(N, nT),
            in_specs=[
                pl.BlockSpec((None, None, cin_blk, tile_len),
                             lambda n, t: (n, t, 0, 0)),
                pl.BlockSpec((4 * Cout, contr), lambda n, t: (0, 0)),
            ],
            out_specs=pl.BlockSpec((None, None, 4 * Cout, tpix),
                                   lambda n, t: (n, t, 0, 0)),
            scratch_shapes=[pltpu.VMEM((contr, tpix), compute_dtype)],
        ),
        compiler_params=pltpu.CompilerParams(
            dimension_semantics=("parallel", "parallel"),  # v7x megacore split
            vmem_limit_bytes=vmem_limit,
        ),
    )(x_tiles, wbig)

    # ---- drop pad columns / pad rows and interleave back to NCHW ------------
    # out_raw[n, t, (2i+j)*Cout+co, trow*Wp + wp] = out[n, co, 2(tT+trow)+i, 2(wp-p)+j]
    out = out_raw.reshape(N, nT, 2, 2, Cout, T, Wp)[..., p:p + W]
    out = jnp.transpose(out, (0, 4, 1, 5, 2, 6, 3))
    out = out.reshape(N, Cout, 2 * H_pad, 2 * W)[:, :, :2 * H, :]
    return out


def _reference(x_nchw, w_oihw, bias):
    """Pure-JAX mirror of the PyTorch forward (cat x4 + PixelShuffle(2) + conv)."""
    N, C, H, W = x_nchw.shape
    K = w_oihw.shape[-1]
    cat = jnp.concatenate([x_nchw] * 4, axis=1)                    # (N, 4C, H, W)
    u = (cat.reshape(N, C, 2, 2, H, W)
            .transpose(0, 1, 4, 2, 5, 3)
            .reshape(N, C, 2 * H, 2 * W))                          # PixelShuffle(2)
    out = jax.lax.conv_general_dilated(
        u, w_oihw, window_strides=(1, 1),
        padding=((K // 2, K // 2), (K // 2, K // 2)),
        dimension_numbers=("NCHW", "OIHW", "NCHW"),
        precision=jax.lax.Precision.HIGHEST)
    return out + bias.reshape(1, -1, 1, 1)


if __name__ == "__main__":
    N, Cin, H, W = 2, 4, 16, 16
    Cout, K = 8, 3

    key = jax.random.PRNGKey(0)
    kx, kw, kb = jax.random.split(key, 3)
    x = jax.random.normal(kx, (N, Cin, H, W), dtype=jnp.float32)

    # nn.Conv2d default init: U(-1/sqrt(fan_in), 1/sqrt(fan_in)), fan_in=Cin*K*K
    bound = 1.0 / math.sqrt(Cin * K * K)
    w = jax.random.uniform(kw, (Cout, Cin, K, K), jnp.float32, -bound, bound)
    b = jax.random.uniform(kb, (Cout,), jnp.float32, -bound, bound)

    ref = jax.block_until_ready(_reference(x, w, b))

    # f32 path with an explicit row tile (grid = (N, H//T) = (2, 2)).
    f32_fn = jax.jit(partial(upsample_conv, compute_dtype=jnp.float32,
                             row_tile=8))
    out = jax.block_until_ready(f32_fn(x, w, b))
    assert out.shape == (N, Cout, 2 * H, 2 * W), out.shape
    assert jnp.allclose(out, ref, rtol=1e-4, atol=2e-4), \
        f"f32 max err {jnp.max(jnp.abs(out - ref))}"

    # Row tile that does NOT divide H (exercises the bottom-row padding path).
    f32_rag = jax.jit(partial(upsample_conv, compute_dtype=jnp.float32,
                              row_tile=5))
    out_rag = jax.block_until_ready(f32_rag(x, w, b))
    assert jnp.allclose(out_rag, ref, rtol=1e-4, atol=2e-4), \
        f"ragged-tile max err {jnp.max(jnp.abs(out_rag - ref))}"

    # bf16 operand path (native MXU rate; f32 accumulation) with a bf16 output
    # stream and the default (auto) row tile.
    bf16_fn = jax.jit(partial(upsample_conv, compute_dtype=jnp.bfloat16,
                              out_dtype=jnp.bfloat16))
    out_bf16 = jax.block_until_ready(bf16_fn(x, w, b)).astype(jnp.float32)
    assert jnp.allclose(out_bf16, ref, rtol=5e-2, atol=5e-2), \
        f"bf16 max err {jnp.max(jnp.abs(out_bf16 - ref))}"

    print("KERNEL_OK")
</pallas_src>

<mosaic_0001>
module attributes {stable_mosaic.version = 11 : i64} {
  func.func @upsample_conv_kernel(%arg0: i32, %arg1: i32, %arg2: memref<1x1x8x182xf32, #tpu.memory_space<vmem>>, %arg3: memref<32x80xf32, #tpu.memory_space<vmem>>, %arg4: memref<1x1x32x144xf32, #tpu.memory_space<vmem>>, %arg5: memref<80x144xf32, #tpu.memory_space<vmem>>) attributes {dimension_semantics = [#tpu.dimension_semantics<parallel>, #tpu.dimension_semantics<parallel>], iteration_bounds = array<i64: 2, 2>, scalar_prefetch = 0 : i64, scratch_operands = 1 : i64, tpu.core_type = #tpu.core_type<tc>, window_params = [{transform_indices = @transform_0, window_bounds = array<i64: 1, 1, 8, 182>}, {pipeline_mode = #tpu.pipeline_mode<synchronous>, transform_indices = @transform_1, window_bounds = array<i64: 32, 80>}, {transform_indices = @transform_2, window_bounds = array<i64: 1, 1, 32, 144>}]} {
    %c0 = arith.constant 0 : index
    %c0_0 = arith.constant 0 : index
    %c0_1 = arith.constant 0 : index
    %c0_2 = arith.constant 0 : index
    %0 = vector.load %arg2[%c0, %c0_0, %c0_1, %c0_2] : memref<1x1x8x182xf32, #tpu.memory_space<vmem>>, vector<1x1x8x144xf32>
    %1 = vector.shape_cast %0 : vector<1x1x8x144xf32> to vector<8x144xf32>
    %c0_3 = arith.constant 0 : index
    %c0_4 = arith.constant 0 : index
    %2 = vector.load %arg5[%c0_3, %c0_4] : memref<80x144xf32, #tpu.memory_space<vmem>>, vector<8x144xf32>
    tpu.vector_store %arg5[%c0_3, %c0_4], %1 {strides = array<i32>} : memref<80x144xf32, #tpu.memory_space<vmem>>, vector<8x144xf32>,
    %c0_5 = arith.constant 0 : index
    %c0_6 = arith.constant 0 : index
    %c0_7 = arith.constant 0 : index
    %c1 = arith.constant 1 : index
    %3 = vector.load %arg2[%c0_5, %c0_6, %c0_7, %c1] : memref<1x1x8x182xf32, #tpu.memory_space<vmem>>, vector<1x1x8x144xf32>
    %4 = vector.shape_cast %3 : vector<1x1x8x144xf32> to vector<8x144xf32>
    %c8 = arith.constant 8 : index
    %c0_8 = arith.constant 0 : index
    %5 = vector.load %arg5[%c8, %c0_8] : memref<80x144xf32, #tpu.memory_space<vmem>>, vector<8x144xf32>
    tpu.vector_store %arg5[%c8, %c0_8], %4 {strides = array<i32>} : memref<80x144xf32, #tpu.memory_space<vmem>>, vector<8x144xf32>,
    %c0_9 = arith.constant 0 : index
    %c0_10 = arith.constant 0 : index
    %c0_11 = arith.constant 0 : index
    %c2 = arith.constant 2 : index
    %6 = vector.load %arg2[%c0_9, %c0_10, %c0_11, %c2] : memref<1x1x8x182xf32, #tpu.memory_space<vmem>>, vector<1x1x8x144xf32>
    %7 = vector.shape_cast %6 : vector<1x1x8x144xf32> to vector<8x144xf32>
    %c16 = arith.constant 16 : index
    %c0_12 = arith.constant 0 : index
    %8 = vector.load %arg5[%c16, %c0_12] : memref<80x144xf32, #tpu.memory_space<vmem>>, vector<8x144xf32>
    tpu.vector_store %arg5[%c16, %c0_12], %7 {strides = array<i32>} : memref<80x144xf32, #tpu.memory_space<vmem>>, vector<8x144xf32>,
    %c0_13 = arith.constant 0 : index
    %c0_14 = arith.constant 0 : index
    %c0_15 = arith.constant 0 : index
    %c18 = arith.constant 18 : index
    %9 = vector.load %arg2[%c0_13, %c0_14, %c0_15, %c18] : memref<1x1x8x182xf32, #tpu.memory_space<vmem>>, vector<1x1x8x144xf32>
    %10 = vector.shape_cast %9 : vector<1x1x8x144xf32> to vector<8x144xf32>
    %c24 = arith.constant 24 : index
    %c0_16 = arith.constant 0 : index
    %11 = vector.load %arg5[%c24, %c0_16] : memref<80x144xf32, #tpu.memory_space<vmem>>, vector<8x144xf32>
    tpu.vector_store %arg5[%c24, %c0_16], %10 {strides = array<i32>} : memref<80x144xf32, #tpu.memory_space<vmem>>, vector<8x144xf32>,
    %c0_17 = arith.constant 0 : index
    %c0_18 = arith.constant 0 : index
    %c0_19 = arith.constant 0 : index
    %c19 = arith.constant 19 : index
    %12 = vector.load %arg2[%c0_17, %c0_18, %c0_19, %c19] : memref<1x1x8x182xf32, #tpu.memory_space<vmem>>, vector<1x1x8x144xf32>
    %13 = vector.shape_cast %12 : vector<1x1x8x144xf32> to vector<8x144xf32>
    %c32 = arith.constant 32 : index
    %c0_20 = arith.constant 0 : index
    %14 = vector.load %arg5[%c32, %c0_20] : memref<80x144xf32, #tpu.memory_space<vmem>>, vector<8x144xf32>
    tpu.vector_store %arg5[%c32, %c0_20], %13 {strides = array<i32>} : memref<80x144xf32, #tpu.memory_space<vmem>>, vector<8x144xf32>,
    %c0_21 = arith.constant 0 : index
    %c0_22 = arith.constant 0 : index
    %c0_23 = arith.constant 0 : index
    %c20 = arith.constant 20 : index
    %15 = vector.load %arg2[%c0_21, %c0_22, %c0_23, %c20] : memref<1x1x8x182xf32, #tpu.memory_space<vmem>>, vector<1x1x8x144xf32>
    %16 = vector.shape_cast %15 : vector<1x1x8x144xf32> to vector<8x144xf32>
    %c40 = arith.constant 40 : index
    %c0_24 = arith.constant 0 : index
    %17 = vector.load %arg5[%c40, %c0_24] : memref<80x144xf32, #tpu.memory_space<vmem>>, vector<8x144xf32>
    tpu.vector_store %arg5[%c40, %c0_24], %16 {strides = array<i32>} : memref<80x144xf32, #tpu.memory_space<vmem>>, vector<8x144xf32>,
    %c0_25 = arith.constant 0 : index
    %c0_26 = arith.constant 0 : index
    %c0_27 = arith.constant 0 : index
    %c36 = arith.constant 36 : index
    %18 = vector.load %arg2[%c0_25, %c0_26, %c0_27, %c36] : memref<1x1x8x182xf32, #tpu.memory_space<vmem>>, vector<1x1x8x144xf32>
    %19 = vector.shape_cast %18 : vector<1x1x8x144xf32> to vector<8x144xf32>
    %c48 = arith.constant 48 : index
    %c0_28 = arith.constant 0 : index
    %20 = vector.load %arg5[%c48, %c0_28] : memref<80x144xf32, #tpu.memory_space<vmem>>, vector<8x144xf32>
    tpu.vector_store %arg5[%c48, %c0_28], %19 {strides = array<i32>} : memref<80x144xf32, #tpu.memory_space<vmem>>, vector<8x144xf32>,
    %c0_29 = arith.constant 0 : index
    %c0_30 = arith.constant 0 : index
    %c0_31 = arith.constant 0 : index
    %c37 = arith.constant 37 : index
    %21 = vector.load %arg2[%c0_29, %c0_30, %c0_31, %c37] : memref<1x1x8x182xf32, #tpu.memory_space<vmem>>, vector<1x1x8x144xf32>
    %22 = vector.shape_cast %21 : vector<1x1x8x144xf32> to vector<8x144xf32>
    %c56 = arith.constant 56 : index
    %c0_32 = arith.constant 0 : index
    %23 = vector.load %arg5[%c56, %c0_32] : memref<80x144xf32, #tpu.memory_space<vmem>>, vector<8x144xf32>
    tpu.vector_store %arg5[%c56, %c0_32], %22 {strides = array<i32>} : memref<80x144xf32, #tpu.memory_space<vmem>>, vector<8x144xf32>,
    %c0_33 = arith.constant 0 : index
    %c0_34 = arith.constant 0 : index
    %c0_35 = arith.constant 0 : index
    %c38 = arith.constant 38 : index
    %24 = vector.load %arg2[%c0_33, %c0_34, %c0_35, %c38] : memref<1x1x8x182xf32, #tpu.memory_space<vmem>>, vector<1x1x8x144xf32>
    %25 = vector.shape_cast %24 : vector<1x1x8x144xf32> to vector<8x144xf32>
    %c64 = arith.constant 64 : index
    %c0_36 = arith.constant 0 : index
    %26 = vector.load %arg5[%c64, %c0_36] : memref<80x144xf32, #tpu.memory_space<vmem>>, vector<8x144xf32>
    tpu.vector_store %arg5[%c64, %c0_36], %25 {strides = array<i32>} : memref<80x144xf32, #tpu.memory_space<vmem>>, vector<8x144xf32>,
    %cst = arith.constant 1.000000e+00 : f32
    %27 = vector.broadcast %cst : f32 to vector<8x144xf32>
    %c72 = arith.constant 72 : index
    %c0_37 = arith.constant 0 : index
    %28 = vector.load %arg5[%c72, %c0_37] : memref<80x144xf32, #tpu.memory_space<vmem>>, vector<8x144xf32>
    tpu.vector_store %arg5[%c72, %c0_37], %27 {strides = array<i32>} : memref<80x144xf32, #tpu.memory_space<vmem>>, vector<8x144xf32>,
    %c0_38 = arith.constant 0 : index
    %c0_39 = arith.constant 0 : index
    %29 = vector.load %arg3[%c0_38, %c0_39] : memref<32x80xf32, #tpu.memory_space<vmem>>, vector<32x80xf32>
    %c0_40 = arith.constant 0 : index
    %c0_41 = arith.constant 0 : index
    %30 = vector.load %arg5[%c0_40, %c0_41] : memref<80x144xf32, #tpu.memory_space<vmem>>, vector<80x144xf32>
    %cst_42 = arith.constant dense<0.000000e+00> : vector<32x144xf32>
    %31 = tpu.matmul %29, %30, %cst_42 {dimension_numbers = #tpu.dot_dimension_numbers<[1], [0], [0], [1], [0, 0, 1, 1], [], []>} : vector<32x80xf32>, vector<80x144xf32>, vector<32x144xf32> -> vector<32x144xf32>
    %c0_43 = arith.constant 0 : index
    %c0_44 = arith.constant 0 : index
    %c0_45 = arith.constant 0 : index
    %c0_46 = arith.constant 0 : index
    %32 = vector.load %arg4[%c0_43, %c0_44, %c0_45, %c0_46] : memref<1x1x32x144xf32, #tpu.memory_space<vmem>>, vector<1x1x32x144xf32>
    %33 = vector.shape_cast %32 : vector<1x1x32x144xf32> to vector<32x144xf32>
    %34 = vector.shape_cast %31 : vector<32x144xf32> to vector<1x1x32x144xf32>
    tpu.vector_store %arg4[%c0_43, %c0_44, %c0_45, %c0_46], %34 {strides = array<i32>} : memref<1x1x32x144xf32, #tpu.memory_space<vmem>>, vector<1x1x32x144xf32>,
    return
  }
  func.func @transform_0(%arg0: i32, %arg1: i32) -> (i32, i32, i32, i32) {
    %c0_i32 = arith.constant 0 : i32
    %c0_i32_0 = arith.constant 0 : i32
    %c0_i32_1 = arith.constant 0 : i32
    return %arg0, %arg1, %c0_i32, %c0_i32_0 : i32, i32, i32, i32
  }
  func.func @transform_1(%arg0: i32, %arg1: i32) -> (i32, i32) {
    %c0_i32 = arith.constant 0 : i32
    %c0_i32_0 = arith.constant 0 : i32
    %c0_i32_1 = arith.constant 0 : i32
    return %c0_i32, %c0_i32_0 : i32, i32
  }
  func.func @transform_2(%arg0: i32, %arg1: i32) -> (i32, i32, i32, i32) {
    %c0_i32 = arith.constant 0 : i32
    %c0_i32_0 = arith.constant 0 : i32
    %c0_i32_1 = arith.constant 0 : i32
    return %arg0, %arg1, %c0_i32, %c0_i32_0 : i32, i32, i32, i32
  }
}

</mosaic_0001>

<bundles_post_ra>
// kernel: tile.8
= control target key start
LH: loop header
LB: loop body
LE: loop exit
PB: predicated region body
PF: predicated region fallthrough
CT: control target
= control target key end

     0   :  { %s22_s0 = inlined_call_operand.vmem [shape: f32[8], index: 0, kind: input, shape index: {}]   ;;  %s23_s1 = inlined_call_operand.vmem [shape: f32[4,8], index: 1, kind: output, shape index: {}]  }
   0x1   :  { %v4_v0 = vld [vmem:[%s22_s0] ss:$0 sm:$0xff] }
   0x2   :  { %5 = vst [vmem:[%s23_s1] sm:$0xf] %v4_v0 }

// kernel: tile.0
= control target key start
LH: loop header
LB: loop body
LE: loop exit
PB: predicated region body
PF: predicated region fallthrough
CT: control target
= control target key end

     0   :  { %s67_s8 = smov 125   ;;  %vm8_vm0 = vcmask 7168   ;;  %s68_s11 = smov 126   ;;  %s118_s0 = inlined_call_operand.vmem [shape: f32[4,8], index: 0, kind: input, shape index: {}]   ;;  %s119_s1 = inlined_call_operand.vmem [shape: f32[32,1], index: 1, kind: output, shape index: {}]  }
   0x1   :  { %v5_v0 = vld [vmem:[%s118_s0] sm:$0xf]  ;;  %s66_s0 = smov 127   ;;  %s69_s12 = smov 124  }
   0x2   :  { %6 = vst [vmem:[#allocation0] sm:$0xf] %v5_v0  ;;  %s70_s13 = smov 123   ;;  %s71_s14 = smov 122  }
   0x3   :  { %s72_s15 = smov 121  }
   0x9   :  { %v10_v1 = vld [vmem:[#allocation0] sm:$0xf]  }
   0xa   :  { %v22_v2 = vld [vmem:[#allocation0] sm:$0xf]   ;;  %11 = vrot.lane.b32.xlu0 %v10_v1, %s66_s0 }
   0xb   :  { %23 = vrot.lane.b32.xlu1 %v22_v2, %s67_s8  ;;  %v16_v3 = vld [vmem:[#allocation0] sm:$0xf]  }
   0xc   :  { %v28_v4 = vld [vmem:[#allocation0] sm:$0xf]  }
   0xd   :  { %v7_v5 = vld [vmem:[#allocation0] sm:$0xf]  }
   0xe   :  { %9 = vst.msk [vmem:[%s119_s1] ss:$8 sm:$0xf] %vm8_vm0, %v7_v5   ;;  %17 = vrot.lane.b32.xlu0 %v16_v3, %s68_s11  ;;  %v34_v6 = vld [vmem:[#allocation0] sm:$0xf]  }
   0xf   :  { %29 = vrot.lane.b32.xlu1 %v28_v4, %s69_s12  ;;  %v40_v7 = vld [vmem:[#allocation0] sm:$0xf]  }
  0x10   :  { %v46_v8 = vld [vmem:[#allocation0] sm:$0xf]  }
  0x12   :  { %35 = vrot.lane.b32.xlu0 %v34_v6, %s70_s13 }
  0x13   :  { %41 = vrot.lane.b32.xlu1 %v40_v7, %s71_s14 }
  0x16   :  { %47 = vrot.lane.b32.xlu0 %v46_v8, %s72_s15 }
  0x7c   :  { %v12_v9 = vpop.permute.xlu0 %11  }
  0x7d   :  { %v24_v10 = vpop.permute.xlu1 %23   ;;  %52 = vst.msk [vmem:[%s119_s1 + $0x1] ss:$8 sm:$0xf] %vm8_vm0, %v12_v9  }
  0x7e   :  { %54 = vst.msk [vmem:[%s119_s1 + $0x3] ss:$8 sm:$0xf] %vm8_vm0, %v24_v10  }
  0x80   :  { %v18_v11 = vpop.permute.xlu0 %17  }
  0x81   :  { %v30_v12 = vpop.permute.xlu1 %29   ;;  %53 = vst.msk [vmem:[%s119_s1 + $0x2] ss:$8 sm:$0xf] %vm8_vm0, %v18_v11  }
  0x82   :  { %55 = vst.msk [vmem:[%s119_s1 + $0x4] ss:$8 sm:$0xf] %vm8_vm0, %v30_v12  }
  0x84   :  { %v36_v13 = vpop.permute.xlu0 %35  }
  0x85   :  { %v42_v14 = vpop.permute.xlu1 %41   ;;  %56 = vst.msk [vmem:[%s119_s1 + $0x5] ss:$8 sm:$0xf] %vm8_vm0, %v36_v13  }
  0x86   :  { %57 = vst.msk [vmem:[%s119_s1 + $0x6] ss:$8 sm:$0xf] %vm8_vm0, %v42_v14  }
  0x88   :  { %v48_v15 = vpop.permute.xlu0 %47  }
  0x89   :  { %58 = vst.msk [vmem:[%s119_s1 + $0x7] ss:$8 sm:$0xf] %vm8_vm0, %v48_v15  }

// kernel: upsample_conv.1
= control target key start
LH: loop header
LB: loop body
LE: loop exit
PB: predicated region body
PF: predicated region fallthrough
CT: control target
= control target key end

     0   :  { %s680_s9 = smov 0   ;;  %s682_s10 = smov 0   ;;  %s784_s0 = inlined_call_operand.vmem [shape: f32[2,2,8,182], index: 0, kind: input, shape index: {}]   ;;  %s785_s1 = inlined_call_operand.vmem [shape: f32[32,80], index: 1, kind: input, shape index: {}]   ;;  %s786_s2 = inlined_call_operand.vmem [shape: f32[2,2,32,144], index: 2, kind: output, shape index: {}]  }
   0x1   :  { %s684_s11 = smov 0   ;;  %s686_s12 = smov 0  }
   0x2   :  { %s688_s13 = smov 0  }
   0x3 LB: > { %s21_s14 = sadd.s32 1, %s645_s11  ;;  %s24_s15 = sadd.s32 1, %s649_s12  ;;  %s653_s13 = sphi %s688_s13, %s12_s13   ;;  %s649_s12 = sphi %s686_s12, %s790_s12   ;;  %s645_s11 = sphi %s684_s11, %s789_s11   ;;  %s641_s10 = sphi %s682_s10, %s788_s10   ;;  %s637_s9 = sphi %s680_s9, %s787_s9  }
   0x4   : > { %p22_p0 = scmp.ge.s32.totalorder %s21_s14, 2  ;;  %p532_p1 = scmp.ge.s32.totalorder %s653_s13, 1 }
   0x5   : > { %p132_p2 = scmp.lt.s32.totalorder %s653_s13, 5 }
   0x6   : > { %s792_s14 = smov (%p22_p0, %s21_s14), 0  ;;  %s794_s15 = smov (!%p22_p0, %s24_s15), %s649_s12 }
   0x7   : > { %p133_p3 = pnand %p532_p1, %p132_p2  ;;  %p26_p4 = scmp.ge.s32.totalorder %s794_s15, 2 }
   0x8   : > { %p162_p5 = scmp.lt.s32.totalorder (!%p133_p3), %s641_s10, 1  ;;  %p164_p6 = scmp.lt.s32.totalorder (!%p133_p3), %s637_s9, 1 }
   0x9   : > { %s796_s15 = smov (%p26_p4, %s794_s15), 0  ;;  %136 = sbr.rel (%p133_p3) target bundleno = 376 (0x178), region = 28 }
   0xa   : > { %s656_s23 = smov (!%p133_p3), 90   ;;  %s657_s24 = smov (!%p133_p3), 91  }
   0xb   : > { %s658_s25 = smov (!%p133_p3), 92   ;;  %s659_s26 = smov (!%p133_p3), 108  }
   0xc   : > { %s660_s27 = smov (!%p133_p3), 109   ;;  %s661_s28 = smov (!%p133_p3), 110  }
   0xd   : > { %s662_s29 = smov (!%p133_p3), 126   ;;  %s664_s30 = smov (!%p133_p3), 127  }
   0xe   : > { %vm183_vm0 = vcmask 130048   ;;  %v655_v0 = vmov 1.0   ;;  %s798_s10 = smov (!%p162_p5, %s641_s10), 1  ;;  %s800_s9 = smov (!%p164_p6, %s637_s9), 1  ;;  %v663_v4 = vmov 0.0   ;;  %vm291_vm1 = vcmask 736256  }
   0xf   : > { %298 = vst.msk [vmem:[#allocation2 + $0x98] sm:$0xff] %vm183_vm0, %v655_v0  ;;  %s534_s16 = sshll.u32 %s798_s10, 2  ;;  %s533_s17 = sshll.u32 %s800_s9, 1  ;;  %400 = vmatprep.mubr.f32.mxu0 %v663_v4  ;;  %412 = vmatprep.mubr.f32.mxu1 %v663_v4  ;;  %vm277_vm2 = vcmask 744448   ;;  %vm263_vm3 = vcmask 752640   ;;  %vm249_vm4 = vcmask 883712  }
  0x10   : > { %s168_s18 = sadd.s32 %s534_s16, %s533_s17  ;;  %s536_s3 = sshll.u32 %s800_s9, 3  ;;  %vm235_vm5 = vcmask 891904   ;;  %vm221_vm6 = vcmask 900096   ;;  %vm207_vm7 = vcmask 1031168   ;;  %vm193_vm8 = vcmask 1039360   ;;  %v299_v38 = vld [vmem:[%s785_s1] sm:$0xff] }
  0x11   : > { %s535_s19 = sshll.u32 %s168_s18, 3  ;;  %s537_s4 = sshll.u32 %s798_s10, 4  ;;  %vm323_vm9 = vcmask 654336   ;;  %v301_v39 = vld [vmem:[%s785_s1 + $0x10] sm:$0xff]  ;;  %v300_v40 = vld [vmem:[%s785_s1 + $0x8] sm:$0xff]  ;;  %v302_v41 = vld [vmem:[%s785_s1 + $0x18] sm:$0xff] }
  0x12   : > { %s170_s22 = scalar_lea.vmem %s784_s0, %s535_s19  ;;  %s735_s5 = sadd.s32 %s537_s4, %s536_s3 }
  0x13   : > { %v720_v2 = vld [vmem:[%s170_s22] sm:$0xff]  ;;  %v284_v3 = vld [vmem:[%s170_s22 + $0x8] sm:$0xff]  ;;  %s538_s19 = sshll.u32 %s735_s5, 3 }
  0x14   : > { %287 = vrot.lane.b32.xlu0 %v720_v2, %s656_s23  ;;  %273 = vrot.lane.b32.xlu1 %v720_v2, %s657_s24  ;;  %184 = vst.msk [vmem:[#allocation2 + $0x8] sm:$0xff] %vm183_vm0, %v284_v3  ;;  %s179_s22 = scalar_lea.vmem %s786_s2, %s538_s19 }
  0x16   : > { %v322_v1 = vld [vmem:[#allocation2 + $0x98] sm:$0xff] }
  0x17   : > { %348 = vmatprep.subr.mxu0 %v322_v1  ;;  %545 = vmatprep.subr.mxu1 %v322_v1 }
  0x18   : > { %349 = vmatpush1.msra.mxu0 %v655_v0  ;;  %555 = vmatpush1.msra.mxu1 %v655_v0 }
  0x19   : > { %289 = vrot.lane.b32.xlu0 %v284_v3, %s656_s23  ;;  %275 = vrot.lane.b32.xlu1 %v284_v3, %s657_s24 }
  0x1b   : > { %v304_v37 = vld [vmem:[#allocation2 + $0x8] sm:$0xff] }
  0x1d   : > { %261 = vrot.lane.b32.xlu1 %v284_v3, %s658_s25  ;;  %259 = vrot.lane.b32.xlu0 %v720_v2, %s658_s25 }
  0x21   : > { %247 = vrot.lane.b32.xlu1 %v284_v3, %s659_s26  ;;  %245 = vrot.lane.b32.xlu0 %v720_v2, %s659_s26 }
  0x25   : > { %233 = vrot.lane.b32.xlu1 %v284_v3, %s660_s27  ;;  %231 = vrot.lane.b32.xlu0 %v720_v2, %s660_s27 }
  0x29   : > { %219 = vrot.lane.b32.xlu1 %v284_v3, %s661_s28  ;;  %217 = vrot.lane.b32.xlu0 %v720_v2, %s661_s28 }
  0x2d   : > { %205 = vrot.lane.b32.xlu1 %v284_v3, %s662_s29  ;;  %203 = vrot.lane.b32.xlu0 %v720_v2, %s662_s29 }
  0x31   : > { %191 = vrot.lane.b32.xlu1 %v284_v3, %s664_s30  ;;  %189 = vrot.lane.b32.xlu0 %v720_v2, %s664_s30 }
  0x86   : > { %v288_v5 = vpop.permute.xlu0 %287  ;;  %v274_v6 = vpop.permute.xlu1 %273 }
  0x8b   : > { %v290_v7 = vpop.permute.xlu0 %289  ;;  %v276_v8 = vpop.permute.xlu1 %275 }
  0x8c   : > { %v292_v9 = vsel %vm291_vm1, %v288_v5, %v290_v7  ;;  %296 = vst.msk [vmem:[#allocation2 + $0x88] sm:$0xff] %vm183_vm0, %v290_v7  ;;  %v278_v10 = vsel %vm277_vm2, %v274_v6, %v276_v8  ;;  %282 = vst.msk [vmem:[#allocation2 + $0x78] sm:$0xff] %vm183_vm0, %v276_v8 }
  0x8f   : > { %v262_v11 = vpop.permute.xlu1 %261  ;;  %v260_v12 = vpop.permute.xlu0 %259 }
  0x90   : > { %268 = vst.msk [vmem:[#allocation2 + $0x68] sm:$0xff] %vm183_vm0, %v262_v11  ;;  %v264_v13 = vsel %vm263_vm3, %v260_v12, %v262_v11 }
  0x93   : > { %v248_v14 = vpop.permute.xlu1 %247  ;;  %v246_v15 = vpop.permute.xlu0 %245  ;;  %v320_v16 = vld [vmem:[#allocation2 + $0x88] sm:$0xff]  ;;  %v318_v18 = vld [vmem:[#allocation2 + $0x78] sm:$0xff] }
  0x94   : > { %254 = vst.msk [vmem:[#allocation2 + $0x58] sm:$0xff] %vm183_vm0, %v248_v14  ;;  %v250_v17 = vsel %vm249_vm4, %v246_v15, %v248_v14  ;;  %350 = vmatprep.subr.mxu0 %v320_v16  ;;  %546 = vmatprep.subr.mxu1 %v320_v16 }
  0x95   : > { %351 = vmatpush1.msra.mxu0 %v292_v9  ;;  %556 = vmatpush1.msra.mxu1 %v292_v9 }
  0x96   : > { %352 = vmatprep.subr.mxu0 %v318_v18  ;;  %547 = vmatprep.subr.mxu1 %v318_v18 }
  0x97   : > { %353 = vmatpush1.msra.mxu0 %v278_v10  ;;  %557 = vmatpush1.msra.mxu1 %v278_v10  ;;  %v234_v19 = vpop.permute.xlu1 %233  ;;  %v232_v20 = vpop.permute.xlu0 %231  ;;  %v316_v21 = vld [vmem:[#allocation2 + $0x68] sm:$0xff] }
  0x98   : > { %240 = vst.msk [vmem:[#allocation2 + $0x48] sm:$0xff] %vm183_vm0, %v234_v19  ;;  %v236_v22 = vsel %vm235_vm5, %v232_v20, %v234_v19  ;;  %354 = vmatprep.subr.mxu0 %v316_v21  ;;  %548 = vmatprep.subr.mxu1 %v316_v21 }
  0x99   : > { %355 = vmatpush1.msra.mxu0 %v264_v13  ;;  %558 = vmatpush1.msra.mxu1 %v264_v13 }
  0x9b   : > { %v220_v23 = vpop.permute.xlu1 %219  ;;  %v218_v24 = vpop.permute.xlu0 %217  ;;  %v314_v25 = vld [vmem:[#allocation2 + $0x58] sm:$0xff] }
  0x9c   : > { %226 = vst.msk [vmem:[#allocation2 + $0x38] sm:$0xff] %vm183_vm0, %v220_v23  ;;  %v222_v26 = vsel %vm221_vm6, %v218_v24, %v220_v23  ;;  %356 = vmatprep.subr.mxu0 %v314_v25  ;;  %549 = vmatprep.subr.mxu1 %v314_v25 }
  0x9d   : > { %357 = vmatpush1.msra.mxu0 %v250_v17  ;;  %559 = vmatpush1.msra.mxu1 %v250_v17 }
  0x9f   : > { %v206_v27 = vpop.permute.xlu1 %205  ;;  %v204_v28 = vpop.permute.xlu0 %203  ;;  %v312_v29 = vld [vmem:[#allocation2 + $0x48] sm:$0xff] }
  0xa0   : > { %212 = vst.msk [vmem:[#allocation2 + $0x28] sm:$0xff] %vm183_vm0, %v206_v27  ;;  %v208_v30 = vsel %vm207_vm7, %v204_v28, %v206_v27  ;;  %358 = vmatprep.subr.mxu0 %v312_v29  ;;  %550 = vmatprep.subr.mxu1 %v312_v29 }
  0xa1   : > { %359 = vmatpush1.msra.mxu0 %v236_v22  ;;  %560 = vmatpush1.msra.mxu1 %v236_v22 }
  0xa3   : > { %v192_v31 = vpop.permute.xlu1 %191  ;;  %v190_v32 = vpop.permute.xlu0 %189  ;;  %v310_v33 = vld [vmem:[#allocation2 + $0x38] sm:$0xff] }
  0xa4   : > { %198 = vst.msk [vmem:[#allocation2 + $0x18] sm:$0xff] %vm183_vm0, %v192_v31  ;;  %v194_v34 = vsel %vm193_vm8, %v190_v32, %v192_v31  ;;  %360 = vmatprep.subr.mxu0 %v310_v33  ;;  %551 = vmatprep.subr.mxu1 %v310_v33 }
  0xa5   : > { %361 = vmatpush1.msra.mxu0 %v222_v26  ;;  %561 = vmatpush1.msra.mxu1 %v222_v26 }
  0xa7   : > { %v308_v35 = vld [vmem:[#allocation2 + $0x28] sm:$0xff] }
  0xa8   : > { %362 = vmatprep.subr.mxu0 %v308_v35  ;;  %552 = vmatprep.subr.mxu1 %v308_v35 }
  0xa9   : > { %363 = vmatpush1.msra.mxu0 %v208_v30  ;;  %562 = vmatpush1.msra.mxu1 %v208_v30 }
  0xab   : > { %v306_v36 = vld [vmem:[#allocation2 + $0x18] sm:$0xff] }
  0xac   : > { %364 = vmatprep.subr.mxu0 %v306_v36  ;;  %553 = vmatprep.subr.mxu1 %v306_v36 }
  0xad   : > { %365 = vmatpush1.msra.mxu0 %v194_v34  ;;  %563 = vmatpush1.msra.mxu1 %v194_v34 }
  0xae   : > { %366 = vmatprep.subr.mxu0 %v304_v37  ;;  %554 = vmatprep.subr.mxu1 %v304_v37 }
  0xaf   : > { %367 = vmatpush1.msra.mxu0 %v720_v2  ;;  %564 = vmatpush1.msra.mxu1 %v720_v2 }
  0xb0   : > { %539 = vmatmul.mubr.msk.f32.vlgmr.msra.gmra.mxu0 %vm323_vm9, %v299_v38  ;;  %541 = vmatmul.mubr.msk.f32.vlgmr.msra.gmra.mxu1 %vm323_vm9, %v301_v39 }
  0xb1   : > { %406 = vmatprep.mubr.f32.mxu0 %v663_v4  ;;  %418 = vmatprep.mubr.f32.mxu1 %v663_v4 }
  0xb4   : > { %540 = vmatmul.mubr.msk.f32.gmra.mxu0 %vm323_vm9, %v300_v40  ;;  %542 = vmatmul.mubr.msk.f32.gmra.mxu1 %vm323_vm9, %v302_v41 }
 0x170   : > { %v402_v42 = vpop.f32.mrf.mxu0  ;;  %v414_v43 = vpop.f32.mrf.mxu1 }
 0x171   : > { %425 = vst [vmem:[%s179_s22] sm:$0xff] %v402_v42  ;;  %429 = vst [vmem:[%s179_s22 + $0x20] sm:$0xff] %v414_v43 }
 0x172   : > { %v404_v44 = vpop.f32.mrf.mxu0  ;;  %v416_v45 = vpop.f32.mrf.mxu1 }
 0x173   : > { %426 = vst.msk [vmem:[%s179_s22 + $0x8] sm:$0xff] %vm183_vm0, %v404_v44  ;;  %430 = vst.msk [vmem:[%s179_s22 + $0x28] sm:$0xff] %vm183_vm0, %v416_v45 }
 0x174   : > { %v408_v46 = vpop.f32.mrf.mxu0  ;;  %v420_v47 = vpop.f32.mrf.mxu1 }
 0x175   : > { %427 = vst [vmem:[%s179_s22 + $0x10] sm:$0xff] %v408_v46  ;;  %431 = vst [vmem:[%s179_s22 + $0x30] sm:$0xff] %v420_v47 }
 0x176   : > { %v410_v48 = vpop.f32.mrf.mxu0  ;;  %v422_v49 = vpop.f32.mrf.mxu1 }
 0x177   : > { %428 = vst.msk [vmem:[%s179_s22 + $0x18] sm:$0xff] %vm183_vm0, %v410_v48  ;;  %432 = vst.msk [vmem:[%s179_s22 + $0x38] sm:$0xff] %vm183_vm0, %v422_v49 }
 0x178 PF: > { %s12_s13 = sadd.s32 1, %s653_s13   ;;  %s787_s9 = smov %s645_s11 }
 0x179   : > { %p9_p7 = scmp.ge.s32.totalorder %s12_s13, 6   ;;  %s788_s10 = smov %s649_s12 }
 0x17a   : > { %s789_s11 = smov %s792_s14  ;;  %s790_s12 = smov %s796_s15 }
 0x17b   :  { %11 = sbr.rel (!%p9_p7) target bundleno = 3 (0x3), region = 58 }

</bundles_post_ra>
